<compile_context>
chip_gen: v7x
topology: tpu7x:2x2x1
jax: 0.10.0
libtpu: 0.0.40
codegen_flags: <defaults>
</compile_context>

<pallas_src>
import functools

import jax
import jax.numpy as jnp
from jax.experimental import pallas as pl
from jax.experimental.pallas import tpu as pltpu


def _gather_pack_kernel(ids_ref, *refs, pack: int, apply_dropout: bool):
    """refs = (row_ref_0 .. row_ref_{pack-1}[, mask_ref], out_ref).

    Each row_ref is the (1, 1, D) embedding row for one token of this grid step,
    already DMA'd from HBM by its data-dependent BlockSpec index_map (the token
    ids live in SMEM via scalar prefetch, so `ids_ref` is only used by the
    index_maps, not in the body).
    """
    del ids_ref  # consumed by the index_maps
    row_refs = refs[:pack]
    if apply_dropout:
        mask_ref = refs[pack]
        out_ref = refs[pack + 1]
    else:
        mask_ref = None
        out_ref = refs[pack]

    # Pack `pack` gathered rows along lanes -> (1, 1, pack*D) lane-dense slab.
    packed = jnp.concatenate([r[...] for r in row_refs], axis=-1)

    if apply_dropout:
        # mask is pre-scaled: values are 0.0 (dropped) or 1/(1-p) (kept).
        packed = packed * mask_ref[...]

    out_ref[...] = packed.astype(out_ref.dtype)


def word_embedding_forward(ids, table, *, use_dropout=True, training=False,
                           seed=0, pack=None):
    """ids: (B, S) int32 token ids in [0, ntoken]; table: (ntoken+1, emb_dim)."""
    B, S = ids.shape
    V, D = table.shape
    N = B * S

    # Tokens packed per grid step; choose it so the output block is lane-dense
    # (pack*D a multiple of 128) when the embedding dim allows it.
    if pack is None:
        pack = 128 // D if (D < 128 and 128 % D == 0) else 1
    pack = max(1, int(pack))

    n_steps = pl.cdiv(N, pack)
    Np = n_steps * pack

    # Clamp ids so a bad token id can never trigger an out-of-bounds row DMA
    # (nn.Embedding would raise; the clamp keeps the kernel memory-safe).
    ids_flat = jnp.clip(ids.reshape(-1).astype(jnp.int32), 0, V - 1)
    if Np != N:
        ids_flat = jnp.pad(ids_flat, (0, Np - N))  # pad with a valid (row 0) index

    apply_dropout = bool(use_dropout and training)

    # Table viewed as (V, 1, D): a (1, 1, D) block's trailing dims equal the full
    # array dims, so the row-gather block shape is always layout-legal.
    table_rows = table.reshape(V, 1, D)

    def table_map(t):
        # index_map receives (grid_i, ids_smem_ref); returns BLOCK indices.
        return lambda i, ids_smem: (ids_smem[i * pack + t], 0, 0)

    in_specs = [pl.BlockSpec((1, 1, D), table_map(t)) for t in range(pack)]
    operands = [table_rows] * pack

    if apply_dropout:
        # nn.Dropout() default p = 0.5; pre-scaled keep mask in {0, 1/(1-p)} = {0, 2}.
        keep = jax.random.bernoulli(jax.random.PRNGKey(seed), 0.5,
                                    (n_steps, 1, pack * D))
        mask = keep.astype(table.dtype) * jnp.asarray(2.0, table.dtype)
        in_specs.append(pl.BlockSpec((1, 1, pack * D), lambda i, ids_smem: (i, 0, 0)))
        operands.append(mask)

    out_spec = pl.BlockSpec((1, 1, pack * D), lambda i, ids_smem: (i, 0, 0))

    kernel = functools.partial(_gather_pack_kernel, pack=pack,
                               apply_dropout=apply_dropout)

    out_packed = pl.pallas_call(
        kernel,
        out_shape=jax.ShapeDtypeStruct((n_steps, 1, pack * D), table.dtype),
        grid_spec=pltpu.PrefetchScalarGridSpec(
            num_scalar_prefetch=1,          # ids land in SMEM, feed the index_maps
            grid=(n_steps,),
            in_specs=in_specs,
            out_specs=out_spec,
        ),
        compiler_params=pltpu.CompilerParams(
            dimension_semantics=("parallel",)),
    )(ids_flat, *operands)

    # (n_steps, 1, pack*D) has the exact same row-major layout as (Np, D):
    # the un-packing reshape is free.
    return out_packed.reshape(Np, D)[:N].reshape(B, S, D)


if __name__ == "__main__":
    # Small, module-consistent shapes.
    ntoken, emb_dim = 50, 32
    B, S = 2, 8

    key = jax.random.PRNGKey(0)
    k_tab, k_ids = jax.random.split(key)

    # (ntoken + 1, emb_dim) table; row `ntoken` is the implicit padding row,
    # same as the PyTorch module.
    table = (jax.random.normal(k_tab, (ntoken + 1, emb_dim), dtype=jnp.float32)
             * 0.1)
    ids = jax.random.randint(k_ids, (B, S), 0, ntoken + 1, dtype=jnp.int32)

    # Eval-mode forward (dropout is identity, matching PyTorch .eval()).
    out = word_embedding_forward(ids, table, use_dropout=True, training=False)
    out = jax.block_until_ready(out)

    ref = jnp.take(table, ids.reshape(-1), axis=0).reshape(B, S, emb_dim)
    assert out.shape == (B, S, emb_dim)
    assert jnp.allclose(out, ref, atol=1e-6), "embedding lookup mismatch"

    # Train-mode forward: every element must be either dropped (0) or kept * 2.
    out_drop = word_embedding_forward(ids, table, use_dropout=True,
                                      training=True, seed=123)
    out_drop = jax.block_until_ready(out_drop)
    assert out_drop.shape == (B, S, emb_dim)
    dropped = jnp.isclose(out_drop, 0.0, atol=1e-6)
    kept = jnp.isclose(out_drop, 2.0 * ref, atol=1e-6)
    assert bool(jnp.all(dropped | kept)), "dropout semantics mismatch"

    print("KERNEL_OK")
</pallas_src>

<mosaic_0001>
module attributes {stable_mosaic.version = 11 : i64} {
  func.func @_gather_pack_kernel(%arg0: i32, %arg1: memref<16xi32, #tpu.memory_space<smem>>, %arg2: memref<1x1x32xf32, #tpu.memory_space<vmem>>, %arg3: memref<1x1x32xf32, #tpu.memory_space<vmem>>, %arg4: memref<1x1x32xf32, #tpu.memory_space<vmem>>, %arg5: memref<1x1x32xf32, #tpu.memory_space<vmem>>, %arg6: memref<1x1x128xf32, #tpu.memory_space<vmem>>) attributes {dimension_semantics = [#tpu.dimension_semantics<parallel>], iteration_bounds = array<i64: 4>, scalar_prefetch = 1 : i64, scratch_operands = 0 : i64, tpu.core_type = #tpu.core_type<tc>, window_params = [{transform_indices = @transform_0, window_bounds = array<i64: 1, 1, 32>}, {transform_indices = @transform_1, window_bounds = array<i64: 1, 1, 32>}, {transform_indices = @transform_2, window_bounds = array<i64: 1, 1, 32>}, {transform_indices = @transform_3, window_bounds = array<i64: 1, 1, 32>}, {transform_indices = @transform_4, window_bounds = array<i64: 1, 1, 128>}]} {
    %c0 = arith.constant 0 : index
    %c0_0 = arith.constant 0 : index
    %c0_1 = arith.constant 0 : index
    %0 = vector.load %arg2[%c0, %c0_0, %c0_1] : memref<1x1x32xf32, #tpu.memory_space<vmem>>, vector<1x1x32xf32>
    %c0_2 = arith.constant 0 : index
    %c0_3 = arith.constant 0 : index
    %c0_4 = arith.constant 0 : index
    %1 = vector.load %arg3[%c0_2, %c0_3, %c0_4] : memref<1x1x32xf32, #tpu.memory_space<vmem>>, vector<1x1x32xf32>
    %c0_5 = arith.constant 0 : index
    %c0_6 = arith.constant 0 : index
    %c0_7 = arith.constant 0 : index
    %2 = vector.load %arg4[%c0_5, %c0_6, %c0_7] : memref<1x1x32xf32, #tpu.memory_space<vmem>>, vector<1x1x32xf32>
    %c0_8 = arith.constant 0 : index
    %c0_9 = arith.constant 0 : index
    %c0_10 = arith.constant 0 : index
    %3 = vector.load %arg5[%c0_8, %c0_9, %c0_10] : memref<1x1x32xf32, #tpu.memory_space<vmem>>, vector<1x1x32xf32>
    %4 = tpu.concatenate %0, %1, %2, %3 in 2 : vector<1x1x32xf32>, vector<1x1x32xf32>, vector<1x1x32xf32>, vector<1x1x32xf32> -> vector<1x1x128xf32>
    %c0_11 = arith.constant 0 : index
    %c0_12 = arith.constant 0 : index
    %c0_13 = arith.constant 0 : index
    %5 = vector.load %arg6[%c0_11, %c0_12, %c0_13] : memref<1x1x128xf32, #tpu.memory_space<vmem>>, vector<1x1x128xf32>
    tpu.vector_store %arg6[%c0_11, %c0_12, %c0_13], %4 {strides = array<i32>} : memref<1x1x128xf32, #tpu.memory_space<vmem>>, vector<1x1x128xf32>,
    return
  }
  func.func @transform_0(%arg0: i32, %arg1: memref<16xi32, #tpu.memory_space<smem>>) -> (i32, i32, i32) {
    %c4_i32 = arith.constant 4 : i32
    %0 = arith.muli %arg0, %c4_i32 : i32
    %c0_i32 = arith.constant 0 : i32
    %1 = arith.addi %0, %c0_i32 : i32
    %2 = arith.index_cast %1 : i32 to index
    %3 = memref.load %arg1[%2] : memref<16xi32, #tpu.memory_space<smem>>
    %c0_i32_0 = arith.constant 0 : i32
    %c0_i32_1 = arith.constant 0 : i32
    %c0_i32_2 = arith.constant 0 : i32
    return %3, %c0_i32_0, %c0_i32_1 : i32, i32, i32
  }
  func.func @transform_1(%arg0: i32, %arg1: memref<16xi32, #tpu.memory_space<smem>>) -> (i32, i32, i32) {
    %c4_i32 = arith.constant 4 : i32
    %0 = arith.muli %arg0, %c4_i32 : i32
    %c1_i32 = arith.constant 1 : i32
    %1 = arith.addi %0, %c1_i32 : i32
    %2 = arith.index_cast %1 : i32 to index
    %3 = memref.load %arg1[%2] : memref<16xi32, #tpu.memory_space<smem>>
    %c0_i32 = arith.constant 0 : i32
    %c0_i32_0 = arith.constant 0 : i32
    %c0_i32_1 = arith.constant 0 : i32
    return %3, %c0_i32, %c0_i32_0 : i32, i32, i32
  }
  func.func @transform_2(%arg0: i32, %arg1: memref<16xi32, #tpu.memory_space<smem>>) -> (i32, i32, i32) {
    %c4_i32 = arith.constant 4 : i32
    %0 = arith.muli %arg0, %c4_i32 : i32
    %c2_i32 = arith.constant 2 : i32
    %1 = arith.addi %0, %c2_i32 : i32
    %2 = arith.index_cast %1 : i32 to index
    %3 = memref.load %arg1[%2] : memref<16xi32, #tpu.memory_space<smem>>
    %c0_i32 = arith.constant 0 : i32
    %c0_i32_0 = arith.constant 0 : i32
    %c0_i32_1 = arith.constant 0 : i32
    return %3, %c0_i32, %c0_i32_0 : i32, i32, i32
  }
  func.func @transform_3(%arg0: i32, %arg1: memref<16xi32, #tpu.memory_space<smem>>) -> (i32, i32, i32) {
    %c4_i32 = arith.constant 4 : i32
    %0 = arith.muli %arg0, %c4_i32 : i32
    %c3_i32 = arith.constant 3 : i32
    %1 = arith.addi %0, %c3_i32 : i32
    %2 = arith.index_cast %1 : i32 to index
    %3 = memref.load %arg1[%2] : memref<16xi32, #tpu.memory_space<smem>>
    %c0_i32 = arith.constant 0 : i32
    %c0_i32_0 = arith.constant 0 : i32
    %c0_i32_1 = arith.constant 0 : i32
    return %3, %c0_i32, %c0_i32_0 : i32, i32, i32
  }
  func.func @transform_4(%arg0: i32, %arg1: memref<16xi32, #tpu.memory_space<smem>>) -> (i32, i32, i32) {
    %c0_i32 = arith.constant 0 : i32
    %c0_i32_0 = arith.constant 0 : i32
    %c0_i32_1 = arith.constant 0 : i32
    return %arg0, %c0_i32, %c0_i32_0 : i32, i32, i32
  }
}

</mosaic_0001>

<bundles_post_ra>
// kernel: tpu_custom_call.1
= control target key start
LH: loop header
LB: loop body
LE: loop exit
PB: predicated region body
PF: predicated region fallthrough
CT: control target
= control target key end

     0   :  { %s739_s0 = inlined_call_operand.vmem [shape: s32[16], index: 0, kind: input, shape index: {}]   ;;  %s740_s1 = inlined_call_operand.vmem [shape: f32[51,1,32], index: 1, kind: input, shape index: {}]   ;;  %s741_s2 = inlined_call_operand.vmem [shape: f32[51,1,32], index: 2, kind: input, shape index: {}]   ;;  %s742_s3 = inlined_call_operand.vmem [shape: f32[51,1,32], index: 3, kind: input, shape index: {}]   ;;  %s743_s4 = inlined_call_operand.vmem [shape: f32[51,1,32], index: 4, kind: input, shape index: {}]   ;;  %s744_s5 = inlined_call_operand.hbm [shape: f32[4,1,128], index: 5, kind: output, shape index: {}]  }
   0x1   :  { %s10_s20 = sshll.u32 %s739_s0, 4  ;;  %s11_s20 = int_to_ptr.vmem [resolvable:$true] %s10_s20 }
   0x2   :  { %s515_s21 = scalar_lea.vmem %s11_s20, 16  ;;  %p520_p1 = scmp.lt.s32.totalorder %s11_s20, %s11_s20 }
   0x3   :  { %p516_p0 = scmp.ne.s32.totalorder %s11_s20, %s515_s21  ;;  %p521_p2 = scmp.lt.s32.totalorder %s515_s21, %s515_s21 }
   0x5   :  { %p522_p3 = por %p521_p2, %p520_p1 }
   0x7   :  { %p523_p4 = pnand %p522_p3, %p516_p0 }
   0x9   :  { %526 = shalt.err (!%p523_p4)  }
   0xa   :  { %s593_s22 = smov [#allocation3]  }
   0xb   :  { %13 = dma.vmem_to_smem %s11_s20, 16, %s593_s22, [#allocation2] }
   0xc   :  { %571 = dma.done.wait [#allocation2], 16 }
   0xd   :  { %572 = vsyncadd [#allocation2], 4294967280 }
   0xe   :  { %15 = sfence }
   0xf   :  { %16 = vsyncpa [#allocation5], 0 }
  0x10   :  { %18 = vsyncpa [#allocation5 + $0x1], 0  ;;  %s631_s23 = smov 0   ;;  %s633_s24 = smov 0  }
  0x11   :  { %s635_s0 = smov 0   ;;  %s637_s25 = smov 0  }
  0x12 LB: > { %s652_s26 = sadd.s32 4294967295, %s591_s25   ;;  %s442_s27 = sadd.s32 4294967294, %s591_s25   ;;  %s591_s25 = sphi %s637_s25, %s750_s25   ;;  %s587_s0 = sphi %s635_s0, %s749_s0   ;;  %s583_s24 = sphi %s633_s24, %s748_s24   ;;  %s579_s23 = sphi %s631_s23, %s747_s23  }
  0x13   : > { %s656_s28 = sadd.s32 1, %s591_s25   ;;  %s157_s29 = sadd.s32 1, %s587_s0 }
  0x14   : > { %s154_s30 = ssub.s32 %s591_s25, %s656_s28  ;;  %p167_p5 = scmp.ne.s32.totalorder %s587_s0, %s583_s24 }
  0x15   : > { %p155_p6 = scmp.eq.s32.totalorder %s154_s30, 0  ;;  %p168_p7 = scmp.eq.s32.totalorder %s652_s26, 3 }
  0x16   : > { %p173_p8 = scmp.ne.s32.totalorder %s583_s24, %s579_s23  ;;  %p174_p9 = scmp.eq.s32.totalorder %s442_s27, 3 }
  0x17   : > { %s667_s6 = scalar_select %p155_p6, %s587_s0, %s157_s29  }
  0x18   : > { %p669_p10 = por %p168_p7, %p167_p5  ;;  %p673_p11 = por %p174_p9, %p173_p8 }
  0x19   : > { %p453_p12 = scmp.ge.s32.totalorder %s591_s25, 1  ;;  %p238_p13 = scmp.lt.s32.totalorder %s591_s25, 5 }
  0x1b   : > { %p239_p0 = pnand %p453_p12, %p238_p13 }
  0x1c   : > { %s454_s9 = sshll.u32 (!%p239_p0), %s652_s26, 2  ;;  %s594_s22 = smov (!%p239_p0), 32   ;;  %vm343_vm0 = vcmask (!%p239_p0), 261120   ;;  %vm345_vm1 = vcmask (!%p239_p0), 523264   ;;  %vm347_vm2 = vcmask (!%p239_p0), 785408  }
  0x1d   : > { %242 = sbr.rel (%p239_p0) target bundleno = 176 (0xb0), region = 36  ;;  %s289_s10 = sadd.s32 (!%p239_p0), 1, %s454_s9 }
  0x1e   : > { %s298_s11 = sadd.s32 (!%p239_p0), 2, %s454_s9  ;;  %s290_s12 = sld [smem:[#allocation3 + %s289_s10]] (!%p239_p0) }
  0x1f   : > { %s299_s13 = sld [smem:[#allocation3 + %s298_s11]] (!%p239_p0)  ;;  %s307_s14 = sadd.s32 (!%p239_p0), 3, %s454_s9 }
  0x20   : > { %s308_s15 = sld [smem:[#allocation3 + %s307_s14]] (!%p239_p0)  ;;  %s595_s10 = smov (!%p239_p0), 64  }
  0x21   : > { %s596_s11 = smov (!%p239_p0), 96   ;;  %s279_s14 = sand.u32 (!%p239_p0), 1, %s583_s24  }
  0x22   : > { %s597_s27 = smov (!%p239_p0), [#allocation4]  }
  0x23   : > { %s531_s29 = sshll.u32 (!%p239_p0), %s597_s27, 4  ;;  %s532_s29 = int_to_ptr.vmem [resolvable:$false] %s531_s29 }
  0x24   : > { %p291_p1 = scmp.lt.s32.totalorder %s290_s12, 50 }
  0x25   : > { %p300_p2 = scmp.lt.s32.totalorder %s299_s13, 50 }
  0x26   : > { %s752_s12 = smov (!%p291_p1, %s290_s12), 50  ;;  %p309_p3 = scmp.lt.s32.totalorder %s308_s15, 50 }
  0x27   : > { %s754_s13 = smov (!%p300_p2, %s299_s13), 50  ;;  %s293_s18 = scalar_lea.vmem %s741_s2, %s752_s12 }
  0x28   : > { %v458_v0 = vld [vmem:[%s293_s18] ss:$0 sm:$0xff]  ;;  %s302_s21 = scalar_lea.vmem %s742_s3, %s754_s13  ;;  %s756_s15 = smov (!%p309_p3, %s308_s15), 50 }
  0x29   : > { %324 = vrot.lane.b32.xlu0 %v458_v0, %s594_s22  ;;  %v459_v1 = vld [vmem:[%s302_s21] ss:$0 sm:$0xff]  ;;  %s311_s30 = scalar_lea.vmem %s743_s4, %s756_s15  ;;  %s282_s12 = sld [smem:[#allocation3 + %s454_s9]] }
  0x2a   : > { %v460_v2 = vld [vmem:[%s311_s30] ss:$0 sm:$0xff]  ;;  %s461_s18 = sshll.u32 %s652_s26, 4  ;;  %s280_s15 = scalar_lea.vmem [#allocation4], %s279_s14 }
  0x2b   : > { %340 = vrot.lane.b32.xlu1 %v460_v2, %s596_s11  ;;  %s363_s19 = sshll.u32 %s280_s15, 4  ;;  %s697_s21 = scalar_lea.hbm %s744_s5, %s461_s18  ;;  %s699_s19 = int_to_ptr.vmem [resolvable:$true] %s363_s19 }
  0x2c   : > { %s351_s26 = scalar_lea.sflag [#allocation5], %s279_s14  ;;  %s527_s22 = scalar_lea.vmem %s699_s19, 16 }
  0x2d   : > { %332 = vrot.lane.b32.xlu0 %v459_v1, %s595_s10  ;;  %p528_p5 = scmp.ne.s32.totalorder %s699_s19, %s527_s22  ;;  %s533_s30 = scalar_lea.vmem %s532_s29, 32 }
  0x2e   : > { %p534_p8 = scmp.lt.s32.totalorder %s699_s19, %s532_s29  ;;  %p535_p9 = scmp.lt.s32.totalorder %s533_s30, %s527_s22 }
  0x2f   : > { %p283_p4 = scmp.lt.s32.totalorder %s282_s12, 50  ;;  %p529_p6 = pnand %p528_p5, %p669_p10 }
  0x30   : > { %p536_p12 = por %p535_p9, %p534_p8 }
  0x31   : > { %s758_s12 = smov (!%p283_p4, %s282_s12), 50  ;;  %p530_p7 = pneg %p529_p6 }
  0x32   : > { %s285_s17 = scalar_lea.vmem %s740_s1, %s758_s12 }
  0x33   : > { %v315_v4 = vld [vmem:[%s285_s17] sm:$0x1]  ;;  %p537_p13 = pnand %p536_p12, %p530_p7 }
  0x9b   : > { %v325_v3 = vpop.permute.xlu0 %324 }
  0x9c   : > { %v344_v5 = vsel %vm343_vm0, %v315_v4, %v325_v3 }
  0x9d   : > { %v341_v7 = vpop.permute.xlu1 %340 }
  0x9f   : > { %v333_v6 = vpop.permute.xlu0 %332 }
  0xa0   : > { %v346_v8 = vsel %vm345_vm1, %v344_v5, %v333_v6 }
  0xa1   : > { %v348_v9 = vsel %vm347_vm2, %v346_v8, %v341_v7 }
  0xa2   : > { %349 = vst [vmem:[%s280_s15] sm:$0x1] %v348_v9 }
  0xa3   : > { %540 = shalt.err (!%p537_p13)
}
  0xa4   : > { %s541_s10 = scalar_lea.hbm %s697_s21, 16  ;;  %s545_s14 = scalar_lea.hbm %s744_s5, 64 }
  0xa5   : > { %p542_p0 = scmp.ne.s32.totalorder %s697_s21, %s541_s10  ;;  %p546_p3 = scmp.lt.u32.totalorder %s697_s21, %s744_s5 }
  0xa6   : > { %p547_p4 = scmp.lt.u32.totalorder %s545_s14, %s541_s10  ;;  %p549_p6 = scmp.lt.u32.totalorder %s541_s10, %s697_s21 }
  0xa7   : > { %p543_p1 = pnand %p542_p0, %p669_p10 }
  0xa8   : > { %p548_p5 = por %p547_p4, %p546_p3 }
  0xa9   : > { %p544_p2 = pneg %p543_p1 }
  0xaa   : > { %p550_p7 = por %p549_p6, %p548_p5 }
  0xac   : > { %p551_p8 = pnand %p550_p7, %p544_p2 }
  0xae   : > { %554 = shalt.err (!%p551_p8)
}
  0xaf   : > { %472 = dma.vmem_to_hbm [thread:$0]  (%p669_p10), %s699_s19, 16, %s697_s21, %s351_s26  }
  0xb0 PF: > { %p478_p9 = scmp.ge.s32.totalorder %s591_s25, 2  ;;  %s375_s17 = sand.u32 1, %s579_s23  }
  0xb1   : > { %s376_s18 = scalar_lea.sflag [#allocation5], %s375_s17 }
  0xb2   : > { %p475_p12 = pnand %p478_p9, %p673_p11 }
  0xb4   : > { %574 = dma.done.wait (!%p475_p12), %s376_s18, 16  }
  0xb5   : > { %576 = vsyncadd (!%p475_p12), %s376_s18, 4294967280  ;;  %p21_p13 = scmp.ge.s32.totalorder %s656_s28, 6   ;;  %s747_s23 = smov %s583_s24 }
  0xb6   : > { %s748_s24 = smov %s587_s0  ;;  %s749_s0 = smov %s667_s6 }
  0xb7   : > { %s750_s25 = smov %s656_s28  ;;  %23 = sbr.rel (!%p21_p13) target bundleno = 18 (0x12), region = 80 }
  0xbe   :  { %380 = vsyncpa [#allocation5], 1 }
  0xbf   :  { %382 = vsyncpa [#allocation5 + $0x1], 1 }

</bundles_post_ra>
